<compile_context>
chip_gen: v5e
topology: v5e:2x2
jax: 0.10.0
libtpu: 0.0.40
codegen_flags: <defaults>
</compile_context>

<pallas_src>
import jax
import jax.numpy as jnp
import numpy as np
from jax.experimental import pallas as pl
from jax.experimental.pallas import tpu as pltpu

HIDDEN = 128     # hidden width of the module (fixed by the PyTorch spec)
LANE = 128       # TPU lane width; output is padded to this for dense stores
B_TILE = 128     # max batch rows per grid step (fits vregs, MXU-height aligned)


def mlp_kernel(x_ref, w1_ref, b1_ref, w2_ref, b2_ref, o_ref):
    x = x_ref[...]                      # (b_tile, in_dim)   in_dim is tiny (4)
    w1 = w1_ref[...]                    # (in_dim, HIDDEN)
    b_tile, in_dim = x.shape

    # ---- Layer 1 on the VPU: K=in_dim unrolled FMAs (MXU would be idle). ----
    # Hoisted broadcast of the bias, then accumulate rank-1 updates.
    h = jnp.broadcast_to(b1_ref[...], (b_tile, HIDDEN))          # (b_tile, 128)
    for k in range(in_dim):             # static unroll, in_dim == 4
        h = h + x[:, k:k + 1] * w1[k:k + 1, :]
    h = jnp.maximum(h, jnp.float32(0.0))                          # ReLU

    # ---- Layer 2 on the MXU: (b_tile,128) @ (128,128), lane-dense output. ----
    o = jnp.dot(h, w2_ref[...], preferred_element_type=jnp.float32)
    o_ref[...] = o + b2_ref[...]        # (b_tile, 128) + (1, 128)


def _round_up(x, m):
    return ((x + m - 1) // m) * m


def cartpole_forward(state, w1, b1, w2, b2):
    """state: (B, input_dim) f32; returns (B, output_dim) f32."""
    B, in_dim = state.shape
    out_dim = w2.shape[1]

    # Pick the batch tile: at most B_TILE, at least a multiple of 8 (sublane
    # granularity) so the BlockSpec is legal and small batches stay cheap.
    b_tile = min(B_TILE, _round_up(B, 8))
    B_pad = _round_up(B, b_tile)
    if B_pad != B:
        state = jnp.pad(state, ((0, B_pad - B), (0, 0)))

    # Pad the output dimension to a full 128-lane slab (dense vst + dense DMA).
    w2_pad = jnp.pad(w2, ((0, 0), (0, LANE - out_dim)))           # (128, 128)
    b2_pad = jnp.pad(b2, ((0, 0), (0, LANE - out_dim)))           # (1, 128)

    grid = (B_pad // b_tile,)

    out_padded = pl.pallas_call(
        mlp_kernel,
        out_shape=jax.ShapeDtypeStruct((B_pad, LANE), jnp.float32),
        grid_spec=pltpu.PrefetchScalarGridSpec(
            num_scalar_prefetch=0,
            grid=grid,
            in_specs=[
                # Only the x tile moves per grid step.
                pl.BlockSpec((b_tile, in_dim), lambda i: (i, 0)),
                # Weights / biases: constant index_map -> DMA'd once, resident.
                pl.BlockSpec((in_dim, HIDDEN), lambda i: (0, 0)),
                pl.BlockSpec((1, HIDDEN), lambda i: (0, 0)),
                pl.BlockSpec((HIDDEN, LANE), lambda i: (0, 0)),
                pl.BlockSpec((1, LANE), lambda i: (0, 0)),
            ],
            out_specs=pl.BlockSpec((b_tile, LANE), lambda i: (i, 0)),
        ),
        compiler_params=pltpu.CompilerParams(
            dimension_semantics=("parallel",),   # shard batch across TCs (v7x)
        ),
    )(state, w1, b1, w2_pad, b2_pad)

    # Strip batch padding and the lane padding of the output dimension.
    return out_padded[:B, :out_dim]


def init_params(key, input_dim, hidden_dim, output_dim):
    """Deterministic init mimicking PyTorch nn.Linear defaults:
    U(-1/sqrt(fan_in), 1/sqrt(fan_in)) for weights and biases.
    Weights stored as (in, out) so the kernel computes x @ W + b."""
    k1, k2, k3, k4 = jax.random.split(key, 4)
    bound1 = 1.0 / np.sqrt(input_dim)
    bound2 = 1.0 / np.sqrt(hidden_dim)
    w1 = jax.random.uniform(k1, (input_dim, hidden_dim), jnp.float32, -bound1, bound1)
    b1 = jax.random.uniform(k2, (1, hidden_dim), jnp.float32, -bound1, bound1)
    w2 = jax.random.uniform(k3, (hidden_dim, output_dim), jnp.float32, -bound2, bound2)
    b2 = jax.random.uniform(k4, (1, output_dim), jnp.float32, -bound2, bound2)
    return w1, b1, w2, b2


if __name__ == "__main__":
    # CartPole: observation dim = 4, action dim = 2.
    # Batch of 256 environments -> 2 grid steps of 128 rows each.
    batch, input_dim, hidden_dim, output_dim = 256, 4, HIDDEN, 2

    key = jax.random.PRNGKey(0)
    kx, kp = jax.random.split(key)
    state = jax.random.normal(kx, (batch, input_dim), dtype=jnp.float32)
    w1, b1, w2, b2 = init_params(kp, input_dim, hidden_dim, output_dim)

    out = cartpole_forward(state, w1, b1, w2, b2)
    out = jax.block_until_ready(out)

    # Pure-JAX reference check of forward semantics.
    ref = jnp.maximum(state @ w1 + b1, 0.0) @ w2 + b2
    np.testing.assert_allclose(np.asarray(out), np.asarray(ref), rtol=1e-5, atol=1e-5)

    print("KERNEL_OK")
</pallas_src>

<mosaic_0001>
module attributes {stable_mosaic.version = 11 : i64} {
  func.func @mlp_kernel(%arg0: i32, %arg1: memref<128x4xf32, #tpu.memory_space<vmem>>, %arg2: memref<4x128xf32, #tpu.memory_space<vmem>>, %arg3: memref<1x128xf32, #tpu.memory_space<vmem>>, %arg4: memref<128x128xf32, #tpu.memory_space<vmem>>, %arg5: memref<1x128xf32, #tpu.memory_space<vmem>>, %arg6: memref<128x128xf32, #tpu.memory_space<vmem>>) attributes {dimension_semantics = [#tpu.dimension_semantics<parallel>], iteration_bounds = array<i64: 2>, scalar_prefetch = 0 : i64, scratch_operands = 0 : i64, tpu.core_type = #tpu.core_type<tc>, window_params = [{transform_indices = @transform_0, window_bounds = array<i64: 128, 4>}, {pipeline_mode = #tpu.pipeline_mode<synchronous>, transform_indices = @transform_1, window_bounds = array<i64: 4, 128>}, {pipeline_mode = #tpu.pipeline_mode<synchronous>, transform_indices = @transform_2, window_bounds = array<i64: 1, 128>}, {pipeline_mode = #tpu.pipeline_mode<synchronous>, transform_indices = @transform_3, window_bounds = array<i64: 128, 128>}, {pipeline_mode = #tpu.pipeline_mode<synchronous>, transform_indices = @transform_4, window_bounds = array<i64: 1, 128>}, {transform_indices = @transform_5, window_bounds = array<i64: 128, 128>}]} {
    %c0 = arith.constant 0 : index
    %c0_0 = arith.constant 0 : index
    %0 = vector.load %arg1[%c0, %c0_0] : memref<128x4xf32, #tpu.memory_space<vmem>>, vector<128x4xf32>
    %c0_1 = arith.constant 0 : index
    %c0_2 = arith.constant 0 : index
    %1 = vector.load %arg2[%c0_1, %c0_2] : memref<4x128xf32, #tpu.memory_space<vmem>>, vector<4x128xf32>
    %c0_3 = arith.constant 0 : index
    %c0_4 = arith.constant 0 : index
    %2 = vector.load %arg3[%c0_3, %c0_4] : memref<1x128xf32, #tpu.memory_space<vmem>>, vector<1x128xf32>
    %3 = vector.shape_cast %2 : vector<1x128xf32> to vector<1x128xf32>
    %4 = vector.broadcast %3 : vector<1x128xf32> to vector<128x128xf32>
    %5 = vector.extract_strided_slice %0 {offsets = [0, 0], sizes = [128, 1], strides = [1, 1]} : vector<128x4xf32> to vector<128x1xf32>
    %6 = vector.extract_strided_slice %1 {offsets = [0, 0], sizes = [1, 128], strides = [1, 1]} : vector<4x128xf32> to vector<1x128xf32>
    %7 = vector.broadcast %5 : vector<128x1xf32> to vector<128x128xf32>
    %8 = vector.broadcast %6 : vector<1x128xf32> to vector<128x128xf32>
    %9 = arith.mulf %7, %8 : vector<128x128xf32>
    %10 = arith.addf %4, %9 : vector<128x128xf32>
    %11 = vector.extract_strided_slice %0 {offsets = [0, 1], sizes = [128, 1], strides = [1, 1]} : vector<128x4xf32> to vector<128x1xf32>
    %12 = vector.extract_strided_slice %1 {offsets = [1, 0], sizes = [1, 128], strides = [1, 1]} : vector<4x128xf32> to vector<1x128xf32>
    %13 = vector.broadcast %11 : vector<128x1xf32> to vector<128x128xf32>
    %14 = vector.broadcast %12 : vector<1x128xf32> to vector<128x128xf32>
    %15 = arith.mulf %13, %14 : vector<128x128xf32>
    %16 = arith.addf %10, %15 : vector<128x128xf32>
    %17 = vector.extract_strided_slice %0 {offsets = [0, 2], sizes = [128, 1], strides = [1, 1]} : vector<128x4xf32> to vector<128x1xf32>
    %18 = vector.extract_strided_slice %1 {offsets = [2, 0], sizes = [1, 128], strides = [1, 1]} : vector<4x128xf32> to vector<1x128xf32>
    %19 = vector.broadcast %17 : vector<128x1xf32> to vector<128x128xf32>
    %20 = vector.broadcast %18 : vector<1x128xf32> to vector<128x128xf32>
    %21 = arith.mulf %19, %20 : vector<128x128xf32>
    %22 = arith.addf %16, %21 : vector<128x128xf32>
    %23 = vector.extract_strided_slice %0 {offsets = [0, 3], sizes = [128, 1], strides = [1, 1]} : vector<128x4xf32> to vector<128x1xf32>
    %24 = vector.extract_strided_slice %1 {offsets = [3, 0], sizes = [1, 128], strides = [1, 1]} : vector<4x128xf32> to vector<1x128xf32>
    %25 = vector.broadcast %23 : vector<128x1xf32> to vector<128x128xf32>
    %26 = vector.broadcast %24 : vector<1x128xf32> to vector<128x128xf32>
    %27 = arith.mulf %25, %26 : vector<128x128xf32>
    %28 = arith.addf %22, %27 : vector<128x128xf32>
    %cst = arith.constant 0.000000e+00 : f32
    %29 = vector.broadcast %cst : f32 to vector<128x128xf32>
    %30 = arith.maximumf %28, %29 : vector<128x128xf32>
    %c0_5 = arith.constant 0 : index
    %c0_6 = arith.constant 0 : index
    %31 = vector.load %arg4[%c0_5, %c0_6] : memref<128x128xf32, #tpu.memory_space<vmem>>, vector<128x128xf32>
    %cst_7 = arith.constant dense<0.000000e+00> : vector<128x128xf32>
    %32 = tpu.matmul %30, %31, %cst_7 {dimension_numbers = #tpu.dot_dimension_numbers<[1], [0], [0], [1], [0, 0, 1, 1], [], []>} : vector<128x128xf32>, vector<128x128xf32>, vector<128x128xf32> -> vector<128x128xf32>
    %c0_8 = arith.constant 0 : index
    %c0_9 = arith.constant 0 : index
    %33 = vector.load %arg5[%c0_8, %c0_9] : memref<1x128xf32, #tpu.memory_space<vmem>>, vector<1x128xf32>
    %34 = vector.broadcast %33 : vector<1x128xf32> to vector<128x128xf32>
    %35 = arith.addf %32, %34 : vector<128x128xf32>
    %c0_10 = arith.constant 0 : index
    %c0_11 = arith.constant 0 : index
    %36 = vector.load %arg6[%c0_10, %c0_11] : memref<128x128xf32, #tpu.memory_space<vmem>>, vector<128x128xf32>
    tpu.vector_store %arg6[%c0_10, %c0_11], %35 {strides = array<i32>} : memref<128x128xf32, #tpu.memory_space<vmem>>, vector<128x128xf32>,
    return
  }
  func.func @transform_0(%arg0: i32) -> (i32, i32) {
    %c0_i32 = arith.constant 0 : i32
    %c0_i32_0 = arith.constant 0 : i32
    return %arg0, %c0_i32 : i32, i32
  }
  func.func @transform_1(%arg0: i32) -> (i32, i32) {
    %c0_i32 = arith.constant 0 : i32
    %c0_i32_0 = arith.constant 0 : i32
    %c0_i32_1 = arith.constant 0 : i32
    return %c0_i32, %c0_i32_0 : i32, i32
  }
  func.func @transform_2(%arg0: i32) -> (i32, i32) {
    %c0_i32 = arith.constant 0 : i32
    %c0_i32_0 = arith.constant 0 : i32
    %c0_i32_1 = arith.constant 0 : i32
    return %c0_i32, %c0_i32_0 : i32, i32
  }
  func.func @transform_3(%arg0: i32) -> (i32, i32) {
    %c0_i32 = arith.constant 0 : i32
    %c0_i32_0 = arith.constant 0 : i32
    %c0_i32_1 = arith.constant 0 : i32
    return %c0_i32, %c0_i32_0 : i32, i32
  }
  func.func @transform_4(%arg0: i32) -> (i32, i32) {
    %c0_i32 = arith.constant 0 : i32
    %c0_i32_0 = arith.constant 0 : i32
    %c0_i32_1 = arith.constant 0 : i32
    return %c0_i32, %c0_i32_0 : i32, i32
  }
  func.func @transform_5(%arg0: i32) -> (i32, i32) {
    %c0_i32 = arith.constant 0 : i32
    %c0_i32_0 = arith.constant 0 : i32
    return %arg0, %c0_i32 : i32, i32
  }
}

</mosaic_0001>

<bundles_post_ra>
// kernel: tpu_custom_call.1
= control target key start
LH: loop header
LB: loop body
LE: loop exit
PB: predicated region body
PF: predicated region fallthrough
CT: control target
= control target key end

     0   :  { %10 = vsyncpa [#allocation3], 0  ;;  %s1539_s0 = inlined_call_operand.vmem [shape: f32[256,4], index: 0, kind: input, shape index: {}]   ;;  %s1540_s1 = inlined_call_operand.vmem [shape: f32[4,128], index: 1, kind: input, shape index: {}]   ;;  %s1541_s2 = inlined_call_operand.vmem [shape: f32[1,128], index: 2, kind: input, shape index: {}]   ;;  %s1542_s3 = inlined_call_operand.vmem [shape: f32[128,128], index: 3, kind: input, shape index: {}]   ;;  %s1543_s4 = inlined_call_operand.vmem [shape: f32[1,128], index: 4, kind: input, shape index: {}]   ;;  %s1544_s5 = inlined_call_operand.hbm [shape: f32[256,128], index: 5, kind: output, shape index: {}]  }
   0x1   :  { %12 = vsyncpa [#allocation3 + $0x1], 0  ;;  %s1081_s18 = smov 0   ;;  %s1083_s19 = smov 0  }
   0x2   :  { %s1085_s20 = smov 0   ;;  %s1087_s21 = smov 0  }
   0x3 LB: > { %s1102_s22 = sadd.s32 4294967295, %s1043_s21   ;;  %s846_s23 = sadd.s32 4294967294, %s1043_s21   ;;  %s1043_s21 = sphi %s1087_s21, %s1550_s21   ;;  %s1039_s20 = sphi %s1085_s20, %s1549_s20   ;;  %s1035_s19 = sphi %s1083_s19, %s1548_s19   ;;  %s1031_s18 = sphi %s1081_s18, %s1547_s18  }
   0x4   : > { %s1106_s24 = sadd.s32 1, %s1043_s21   ;;  %s135_s25 = sadd.s32 1, %s1039_s20 }
   0x5   : > { %s132_s26 = ssub.s32 %s1043_s21, %s1106_s24  ;;  %p145_p0 = scmp.ne.s32.totalorder %s1039_s20, %s1035_s19 }
   0x6   : > { %p133_p1 = scmp.eq.s32.totalorder %s132_s26, 0  ;;  %p146_p2 = scmp.eq.s32.totalorder %s1102_s22, 1 }
   0x7   : > { %p151_p3 = scmp.ne.s32.totalorder %s1035_s19, %s1031_s18  ;;  %p152_p4 = scmp.eq.s32.totalorder %s846_s23, 1 }
   0x8   : > { %s1117_s27 = scalar_select %p133_p1, %s1039_s20, %s135_s25  }
   0x9   : > { %p1119_p5 = por %p146_p2, %p145_p0  ;;  %p1123_p6 = por %p152_p4, %p151_p3 }
   0xa   : > { %p849_p7 = scmp.ge.s32.totalorder %s1043_s21, 1  ;;  %p191_p8 = scmp.lt.s32.totalorder %s1043_s21, 3 }
   0xc   : > { %p192_p9 = pnand %p849_p7, %p191_p8 }
   0xd   : > { %s851_s30 = sshll.u32 (!%p192_p9), %s1102_s22, 4  ;;  %s216_s14 = sand.u32 (!%p192_p9), 1, %s1035_s19  }
   0xe   : > { %195 = sbr.rel (%p192_p9) target bundleno = 472 (0x1d8), region = 40  ;;  %p220_p10 = scmp.lt.s32.totalorder (!%p192_p9), %s851_s30, 31 }
   0xf   : > { %s850_s15 = sshll.u32 (!%p192_p9), %s216_s14, 7  ;;  %s858_s25 = sshll.u32 (!%p192_p9), %s1102_s22, 7 }
  0x10   : > { %s1487_s23 = scalar_lea.vmem (!%p192_p9), [#allocation2], %s850_s15  ;;  %s1001_s13 = scalar_lea.hbm (!%p192_p9), %s1544_s5, 256 }
  0x11   : > { %s781_s7 = sshll.u32 (!%p192_p9), %s1487_s23, 4  ;;  %s782_s7 = int_to_ptr.vmem [resolvable:$true] %s781_s7 }
  0x13   : > { %v1045_v0 = vmov 0   ;;  %s1552_s30 = smov (!%p220_p10, %s851_s30), 31  ;;  %v1046_v17 = vmov 1   ;;  %v1047_v18 = vmov 3   ;;  %v1048_v19 = vmov 2   ;;  %v682_v48 = vld [vmem:[%s1542_s3 + $0x78] sm:$0xff] }
  0x14   : > { %954 = vset.pattern.permute.xlu2 %v1045_v0  ;;  %953 = vset.pattern.permute.xlu1 %v1045_v0  ;;  %s852_s6 = sshll.u32 %s1552_s30, 3  ;;  %v1229_v26 = vld [vmem:[%s1540_s1] sm:$0xf]  ;;  %v681_v49 = vld [vmem:[%s1542_s3 + $0x70] sm:$0xff]  ;;  %v680_v52 = vld [vmem:[%s1542_s3 + $0x68] sm:$0xff] }
  0x15   : > { %952 = vset.pattern.permute.xlu0 %v1045_v0  ;;  %s1133_s9 = scalar_lea.vmem %s1539_s0, %s852_s6  ;;  %v1237_v30 = vperm.slane %v1229_v26, 0  ;;  %v1247_v32 = vld [vmem:[%s1541_s2] ss:$0 sm:$0xff]  ;;  %v1253_v35 = vperm.slane %v1229_v26, 1  ;;  %860 = vmatpush.msra.mxu2 %v682_v48  ;;  %v678_v59 = vld [vmem:[%s1542_s3 + $0x58] sm:$0xff]  ;;  %v677_v60 = vld [vmem:[%s1542_s3 + $0x50] sm:$0xff]  ;;  %s780_s6 = scalar_lea.hbm %s1544_s5, %s858_s25 }
  0x16   : > { %v1136_v1 = vld [vmem:[%s1133_s9 + $0x20] sm:$0xff]  ;;  %v1139_v2 = vld [vmem:[%s1133_s9 + $0x10] sm:$0xff]  ;;  %v1148_v4 = vld [vmem:[%s1133_s9 + $0x28] sm:$0xff]  ;;  %861 = vmatpush.msra.mxu3 %v682_v48  ;;  %859 = vmatpush.msra.mxu1 %v682_v48  ;;  %s783_s8 = sshll.u32 %s780_s6, 4  ;;  %s784_s8 = int_to_ptr.hbm [resolvable:$true] %s783_s8 }
  0x17   : > { %v1142_v3 = vld [vmem:[%s1133_s9] sm:$0xff]  ;;  %269 = vperm.xlu2 %954, %v1136_v1   ;;  %259 = vperm.xlu1 %953, %v1139_v2   ;;  %v1151_v5 = vld [vmem:[%s1133_s9 + $0x18] sm:$0xff]  ;;  %v1154_v6 = vld [vmem:[%s1133_s9 + $0x8] sm:$0xff]  ;;  %s995_s10 = sshra.s32 %s784_s8, 4  ;;  %s996_s10 = int_to_ptr.hbm [resolvable:$true] %s995_s10 }
  0x18   : > { %249 = vperm.xlu0 %952, %v1142_v3   ;;  %v234_v7 = vld [vmem:[%s1133_s9 + $0x40] sm:$0xff]  ;;  %v1161_v8 = vld [vmem:[%s1133_s9 + $0x38] sm:$0xff]  ;;  %v1164_v9 = vld [vmem:[%s1133_s9 + $0x30] sm:$0xff]  ;;  %863 = vmatpush.msra.mxu2 %v681_v49  ;;  %s997_s22 = scalar_lea.hbm %s996_s10, 128  ;;  %p1002_p0 = scmp.lt.s32.totalorder %s996_s10, %s1544_s5 }
  0x19   : > { %v1169_v10 = vld [vmem:[%s1133_s9 + $0x58] sm:$0xff]  ;;  %v1172_v11 = vld [vmem:[%s1133_s9 + $0x50] sm:$0xff]  ;;  %v235_v12 = vld [vmem:[%s1133_s9 + $0x48] sm:$0xff]  ;;  %864 = vmatpush.msra.mxu3 %v681_v49  ;;  %687 = vmatpush.msra.mxu0 %v682_v48  ;;  %p998_p11 = scmp.ne.s32.totalorder %s996_s10, %s997_s22  ;;  %p1003_p1 = scmp.lt.s32.totalorder %s1001_s13, %s997_s22 }
  0x1a   : > { %v1178_v13 = vld [vmem:[%s1133_s9 + $0x70] sm:$0xff]  ;;  %v239_v14 = vld [vmem:[%s1133_s9 + $0x68] sm:$0xff]  ;;  %v238_v15 = vld [vmem:[%s1133_s9 + $0x60] sm:$0xff]  ;;  %866 = vmatpush.msra.mxu2 %v680_v52  ;;  %862 = vmatpush.msra.mxu1 %v681_v49 }
  0x1b   : > { %v1184_v16 = vld [vmem:[%s1133_s9 + $0x78] sm:$0xff]  ;;  %v679_v56 = vld [vmem:[%s1542_s3 + $0x60] sm:$0xff]  ;;  %867 = vmatpush.msra.mxu3 %v680_v52  ;;  %688 = vmatpush.msra.mxu0 %v681_v49  ;;  %v676_v62 = vld [vmem:[%s1542_s3 + $0x48] sm:$0xff]  ;;  %s769_s9 = scalar_lea.sflag [#allocation3], %s216_s14  ;;  %p999_p12 = pnand %p998_p11, %p1119_p5 }
  0x1c   : > { %869 = vmatpush.msra.mxu2 %v679_v56  ;;  %865 = vmatpush.msra.mxu1 %v680_v52  ;;  %p1004_p2 = por %p1003_p1, %p1002_p0 }
  0x1d   : > { %870 = vmatpush.msra.mxu3 %v679_v56  ;;  %689 = vmatpush.msra.mxu0 %v680_v52  ;;  %p1000_p13 = pneg %p999_p12 }
  0x1e   : > { %872 = vmatpush.msra.mxu2 %v678_v59  ;;  %868 = vmatpush.msra.mxu1 %v679_v56 }
  0x1f   : > { %274 = vperm.xlu2 %954, %v1148_v4   ;;  %264 = vperm.xlu1 %953, %v1151_v5   ;;  %p1005_p3 = pnand %p1004_p2, %p1000_p13 }
  0x20   : > { %254 = vperm.xlu0 %952, %v1154_v6   ;;  %873 = vmatpush.msra.mxu3 %v678_v59 }
  0x21   : > { %875 = vmatpush.msra.mxu2 %v677_v60  ;;  %871 = vmatpush.msra.mxu1 %v678_v59 }
  0x22   : > { %876 = vmatpush.msra.mxu3 %v677_v60  ;;  %690 = vmatpush.msra.mxu0 %v679_v56 }
  0x23   : > { %878 = vmatpush.msra.mxu2 %v676_v62  ;;  %874 = vmatpush.msra.mxu1 %v677_v60 }
  0x24   : > { %879 = vmatpush.msra.mxu3 %v676_v62  ;;  %691 = vmatpush.msra.mxu0 %v678_v59 }
  0x25   : > { %877 = vmatpush.msra.mxu1 %v676_v62 }
  0x26   : > { %692 = vmatpush.msra.mxu0 %v677_v60 }
  0x27   : > { %289 = vperm.xlu2 %954, %v234_v7   ;;  %284 = vperm.xlu1 %953, %v1161_v8  }
  0x28   : > { %279 = vperm.xlu0 %952, %v1164_v9   ;;  %693 = vmatpush.msra.mxu0 %v676_v62 }
  0x2f   : > { %304 = vperm.xlu2 %954, %v1169_v10   ;;  %299 = vperm.xlu1 %953, %v1172_v11  }
  0x30   : > { %294 = vperm.xlu0 %952, %v235_v12  }
  0x37   : > { %319 = vperm.xlu2 %954, %v1178_v13   ;;  %314 = vperm.xlu1 %953, %v239_v14  }
  0x38   : > { %309 = vperm.xlu0 %952, %v238_v15  }
  0x3f   : > { %956 = vset.pattern.permute.xlu2 %v1046_v17  ;;  %955 = vset.pattern.permute.xlu1 %v1046_v17 }
  0x40   : > { %324 = vperm.xlu0 %952, %v1184_v16   ;;  %365 = vperm.xlu2 %956, %v1154_v6  }
  0x41   : > { %361 = vperm.xlu1 %955, %v1142_v3  }
  0x48   : > { %959 = vset.pattern.permute.xlu0 %v1047_v18  ;;  %377 = vperm.xlu2 %956, %v1136_v1  }
  0x49   : > { %373 = vperm.xlu1 %955, %v1151_v5   ;;  %587 = vperm.xlu0 %959, %v234_v7  }
  0x50   : > { %385 = vperm.xlu2 %956, %v1164_v9  }
  0x51   : > { %381 = vperm.xlu1 %955, %v1148_v4   ;;  %960 = vset.pattern.permute.xlu0 %v1046_v17 }
  0x52   : > { %369 = vperm.xlu0 %960, %v1139_v2  }
  0x58   : > { %397 = vperm.xlu2 %956, %v235_v12  }
  0x59   : > { %393 = vperm.xlu1 %955, %v234_v7  }
  0x5a   : > { %389 = vperm.xlu0 %960, %v1161_v8  }
  0x60   : > { %409 = vperm.xlu2 %956, %v238_v15  }
  0x61   : > { %405 = vperm.xlu1 %955, %v1169_v10  }
  0x62   : > { %401 = vperm.xlu0 %960, %v1172_v11  }
  0x68   : > { %958 = vset.pattern.permute.xlu2 %v1048_v19 }
  0x69   : > { %957 = vset.pattern.permute.xlu1 %v1048_v19  ;;  %506 = vperm.xlu2 %958, %v238_v15  }
  0x6a   : > { %490 = vperm.xlu1 %957, %v234_v7   ;;  %413 = vperm.xlu0 %960, %v239_v14   ;;  %v674_v7 = vld [vmem:[%s1542_s3 + $0x38] sm:$0xff] }
  0x71   : > { %v270_v20 = vpop.permute.xlu2 %269  ;;  %458 = vperm.xlu2 %958, %v1142_v3  }
  0x72   : > { %961 = vset.pattern.permute.xlu1 %v1047_v18  ;;  %417 = vperm.xlu0 %960, %v1178_v13   ;;  %v332_v40 = vmul.f32 %v1237_v30, %v270_v20  ;;  %v671_v20 = vld [vmem:[%s1542_s3 + $0x20] sm:$0xff] }
  0x73   : > { %603 = vperm.xlu1 %961, %v238_v15  }
  0x74   : > { %v348_v44 = vadd.f32 %v1247_v32, %v332_v40 }
  0x79   : > { %v1206_v21 = vpop.permute.xlu2 %274  ;;  %494 = vperm.xlu2 %958, %v235_v12  }
  0x7a   : > { %965 = vset.pattern.permute.xlu0 %v1048_v19 }
  0x7b   : > { %962 = vset.pattern.permute.xlu1 %v1048_v19  ;;  %510 = vperm.xlu0 %965, %v239_v14  }
  0x7c   : > { %474 = vperm.xlu1 %962, %v1136_v1  }
  0x81   : > { %v1211_v22 = vpop.permute.xlu2 %289  ;;  %964 = vset.pattern.permute.xlu2 %v1047_v18 }
  0x82   : > { %571 = vperm.xlu2 %964, %v1136_v1  }
  0x83   : > { %466 = vperm.xlu0 %965, %v1139_v2  }
  0x84   : > { %963 = vset.pattern.permute.xlu1 %v1047_v18 }
  0x85   : > { %555 = vperm.xlu1 %963, %v1142_v3  }
  0x89   : > { %v1218_v23 = vpop.permute.xlu2 %304  ;;  %v1220_v24 = vpop.permute.xlu1 %259 }
  0x8a   : > { %607 = vperm.xlu2 %964, %v239_v14   ;;  %v1222_v25 = vpop.permute.xlu0 %249 }
  0x8b   : > { %971 = vset.pattern.permute.xlu0 %v1047_v18 }
  0x8c   : > { %559 = vperm.xlu0 %971, %v1154_v6  }
  0x8d   : > { %591 = vperm.xlu1 %963, %v235_v12   ;;  %v672_v12 = vld [vmem:[%s1542_s3 + $0x28] sm:$0xff] }
  0x91   : > { %v1231_v27 = vpop.permute.xlu2 %319  ;;  %v1233_v28 = vpop.permute.xlu1 %264 }
  0x92   : > { %967 = vset.pattern.permute.xlu2 %v1048_v19  ;;  %v255_v29 = vpop.permute.xlu0 %254 }
  0x93   : > { %478 = vperm.xlu2 %967, %v1148_v4   ;;  %v329_v31 = vmul.f32 %v1237_v30, %v255_v29  ;;  %v670_v29 = vld [vmem:[%s1542_s3 + $0x18] sm:$0xff] }
  0x94   : > { %579 = vperm.xlu0 %971, %v1164_v9  }
  0x95   : > { %966 = vset.pattern.permute.xlu1 %v1048_v19  ;;  %v345_v33 = vadd.f32 %v1247_v32, %v329_v31 }
  0x96   : > { %462 = vperm.xlu1 %966, %v1154_v6  }
  0x99   : > { %v1250_v34 = vpop.permute.xlu1 %284 }
  0x9a   : > { %v366_v36 = vpop.permute.xlu2 %365  ;;  %v280_v37 = vpop.permute.xlu0 %279  ;;  %v335_v49 = vmul.f32 %v1237_v30, %v1250_v34 }
  0x9b   : > { %v426_v38 = vmul.f32 %v1253_v35, %v366_v36  ;;  %514 = vperm.xlu2 %967, %v1178_v13   ;;  %v334_v46 = vmul.f32 %v1237_v30, %v280_v37  ;;  %v668_v36 = vld [vmem:[%s1542_s3 + $0x8] sm:$0xff]  ;;  %v333_v37 = vmul.f32 %v1237_v30, %v1206_v21 }
  0x9c   : > { %567 = vperm.xlu0 %971, %v1151_v5  }
  0x9d   : > { %v1258_v39 = vadd.f32 %v426_v38, %v345_v33  ;;  %v350_v50 = vadd.f32 %v1247_v32, %v334_v46  ;;  %v669_v33 = vld [vmem:[%s1542_s3 + $0x10] sm:$0xff]  ;;  %v330_v38 = vmul.f32 %v1237_v30, %v1220_v24  ;;  %v349_v21 = vadd.f32 %v1247_v32, %v333_v37 }
  0x9e   : > { %498 = vperm.xlu1 %966, %v1172_v11  }
  0x9f   : > { %v346_v24 = vadd.f32 %v1247_v32, %v330_v38 }
  0xa1   : > { %v1262_v41 = vpop.permute.xlu1 %299 }
  0xa2   : > { %v378_v42 = vpop.permute.xlu2 %377  ;;  %v295_v43 = vpop.permute.xlu0 %294 }
  0xa3   : > { %v429_v45 = vmul.f32 %v1253_v35, %v378_v42  ;;  %969 = vset.pattern.permute.xlu2 %v1047_v18  ;;  %v337_v57 = vmul.f32 %v1237_v30, %v295_v43 }
  0xa4   : > { %595 = vperm.xlu2 %969, %v1172_v11   ;;  %v673_v11 = vld [vmem:[%s1542_s3 + $0x30] sm:$0xff] }
  0xa5   : > { %v1269_v47 = vadd.f32 %v429_v45, %v348_v44  ;;  %v353_v61 = vadd.f32 %v1247_v32, %v337_v57 }
  0xa6   : > { %968 = vset.pattern.permute.xlu1 %v1047_v18 }
  0xa7   : > { %575 = vperm.xlu1 %968, %v1148_v4   ;;  %v675_v4 = vld [vmem:[%s1542_s3 + $0x40] sm:$0xff] }
  0xa8   : > { %881 = vmatpush.msra.mxu2 %v675_v4  ;;  %882 = vmatpush.msra.mxu3 %v675_v4 }
  0xa9   : > { %v1280_v51 = vpop.permute.xlu1 %314  ;;  %880 = vmatpush.msra.mxu1 %v675_v4  ;;  %694 = vmatpush.msra.mxu0 %v675_v4 }
  0xaa   : > { %v386_v53 = vpop.permute.xlu2 %385  ;;  %v1285_v54 = vpop.permute.xlu0 %309  ;;  %884 = vmatpush.msra.mxu2 %v674_v7  ;;  %885 = vmatpush.msra.mxu3 %v674_v7  ;;  %v341_v38 = vmul.f32 %v1237_v30, %v1280_v51 }
  0xab   : > { %v431_v55 = vmul.f32 %v1253_v35, %v386_v53  ;;  %883 = vmatpush.msra.mxu1 %v674_v7  ;;  %695 = vmatpush.msra.mxu0 %v674_v7  ;;  %v340_v4 = vmul.f32 %v1237_v30, %v1285_v54 }
  0xac   : > { %970 = vset.pattern.permute.xlu2 %v1046_v17  ;;  %887 = vmatpush.msra.mxu2 %v673_v11 }
  0xad   : > { %v1293_v58 = vadd.f32 %v431_v55, %v350_v50  ;;  %421 = vperm.xlu2 %970, %v1184_v16   ;;  %888 = vmatpush.msra.mxu3 %v673_v11  ;;  %v351_v55 = vadd.f32 %v1247_v32, %v335_v49 }
  0xae   : > { %890 = vmatpush.msra.mxu2 %v672_v12  ;;  %886 = vmatpush.msra.mxu1 %v673_v11 }
  0xaf   : > { %611 = vperm.xlu1 %968, %v1178_v13   ;;  %v331_v13 = vmul.f32 %v1237_v30, %v1233_v28  ;;  %891 = vmatpush.msra.mxu3 %v672_v12 }
  0xb0   : > { %893 = vmatpush.msra.mxu2 %v671_v20  ;;  %889 = vmatpush.msra.mxu1 %v672_v12 }
  0xb1   : > { %v347_v28 = vadd.f32 %v1247_v32, %v331_v13  ;;  %894 = vmatpush.msra.mxu3 %v671_v20  ;;  %696 = vmatpush.msra.mxu0 %v673_v11 }
  0xb2   : > { %v398_v63 = vpop.permute.xlu2 %397  ;;  %v1307_v0 = vpop.permute.xlu0 %324  ;;  %896 = vmatpush.msra.mxu2 %v670_v29  ;;  %892 = vmatpush.msra.mxu1 %v671_v20 }
  0xb3   : > { %v434_v1 = vmul.f32 %v1253_v35, %v398_v63  ;;  %v1310_v3 = vpop.permute.xlu1 %361  ;;  %897 = vmatpush.msra.mxu3 %v670_v29  ;;  %697 = vmatpush.msra.mxu0 %v672_v12  ;;  %v1398_v63 = vperm.slane %v1229_v26, 3 }
  0xb4   : > { %899 = vmatpush.msra.mxu2 %v669_v33  ;;  %895 = vmatpush.msra.mxu1 %v670_v29 }
  0xb5   : > { %v1315_v6 = vadd.f32 %v434_v1, %v353_v61  ;;  %973 = vset.pattern.permute.xlu2 %v1048_v19  ;;  %900 = vmatpush.msra.mxu3 %v669_v33  ;;  %v1404_v1 = vperm.slane %v1229_v26, 2 }
  0xb6   : > { %502 = vperm.xlu2 %973, %v1169_v10   ;;  %902 = vmatpush.msra.mxu2 %v668_v36 }
  0xb7   : > { %972 = vset.pattern.permute.xlu1 %v1048_v19  ;;  %903 = vmatpush.msra.mxu3 %v668_v36 }
  0xb8   : > { %482 = vperm.xlu1 %972, %v1164_v9   ;;  %898 = vmatpush.msra.mxu1 %v669_v33 }
  0xb9   : > { %698 = vmatpush.msra.mxu0 %v671_v20  ;;  %v356_v20 = vadd.f32 %v1247_v32, %v340_v4 }
  0xba   : > { %v1332_v14 = vpop.permute.xlu2 %409  ;;  %901 = vmatpush.msra.mxu1 %v668_v36 }
  0xbb   : > { %v374_v15 = vpop.permute.xlu1 %373  ;;  %v1334_v17 = vpop.permute.xlu0 %587  ;;  %699 = vmatpush.msra.mxu0 %v670_v29  ;;  %v437_v26 = vmul.f32 %v1253_v35, %v1332_v14 }
  0xbc   : > { %v428_v9 = vmul.f32 %v1253_v35, %v374_v15 }
  0xbd   : > { %700 = vmatpush.msra.mxu0 %v669_v33 }
  0xbe   : > { %v1344_v31 = vadd.f32 %v428_v9, %v347_v28  ;;  %974 = vset.pattern.permute.xlu2 %v1047_v18  ;;  %v453_v9 = vadd.f32 %v437_v26, %v356_v20 }
  0xbf   : > { %563 = vperm.xlu2 %974, %v1139_v2   ;;  %v667_v2 = vld [vmem:[%s1542_s3] sm:$0xff]  ;;  %701 = vmatpush.msra.mxu0 %v668_v36 }
  0xc0   : > { %518 = vperm.xlu1 %972, %v1184_v16   ;;  %905 = vmatpush.msra.mxu2 %v667_v2 }
  0xc1   : > { %906 = vmatpush.msra.mxu3 %v667_v2  ;;  %904 = vmatpush.msra.mxu1 %v667_v2 }
  0xc2   : > { %702 = vmatpush.msra.mxu0 %v667_v2 }
  0xc3   : > { %v382_v40 = vpop.permute.xlu1 %381  ;;  %v1362_v42 = vpop.permute.xlu2 %506 }
  0xc4   : > { %v430_v43 = vmul.f32 %v1253_v35, %v382_v40  ;;  %v370_v44 = vpop.permute.xlu0 %369 }
  0xc5   : > { %v427_v45 = vmul.f32 %v1253_v35, %v370_v44  ;;  %v328_v44 = vmul.f32 %v1237_v30, %v1222_v25 }
  0xc6   : > { %v1368_v46 = vadd.f32 %v430_v43, %v349_v21  ;;  %v357_v21 = vadd.f32 %v1247_v32, %v341_v38 }
  0xc7   : > { %v1370_v48 = vadd.f32 %v427_v45, %v346_v24  ;;  %615 = vperm.xlu2 %974, %v1184_v16  }
  0xc8   : > { %975 = vset.pattern.permute.xlu1 %v1047_v18 }
  0xc9   : > { %599 = vperm.xlu1 %975, %v1169_v10   ;;  %v339_v10 = vmul.f32 %v1237_v30, %v1218_v23  ;;  %v336_v23 = vmul.f32 %v1237_v30, %v1211_v22  ;;  %v627_v22 = vmul.f32 %v1398_v63, %v1334_v17 }
  0xcb   : > { %v394_v50 = vpop.permute.xlu1 %393  ;;  %v1377_v52 = vpop.permute.xlu2 %458  ;;  %v355_v57 = vadd.f32 %v1247_v32, %v339_v10  ;;  %v344_v10 = vadd.f32 %v1247_v32, %v328_v44 }
  0xcc   : > { %v390_v53 = vpop.permute.xlu0 %389 }
  0xcd   : > { %v432_v16 = vmul.f32 %v1253_v35, %v390_v53 }
  0xcf   : > { %v1381_v56 = vadd.f32 %v432_v16, %v351_v55  ;;  %977 = vset.pattern.permute.xlu2 %v1048_v19 }
  0xd0   : > { %486 = vperm.xlu2 %977, %v1161_v8  }
  0xd1   : > { %976 = vset.pattern.permute.xlu1 %v1048_v19  ;;  %v352_v19 = vadd.f32 %v1247_v32, %v336_v23 }
  0xd2   : > { %470 = vperm.xlu1 %976, %v1151_v5   ;;  %v433_v5 = vmul.f32 %v1253_v35, %v394_v50 }
  0xd3   : > { %v406_v34 = vpop.permute.xlu1 %405  ;;  %v495_v61 = vpop.permute.xlu2 %494 }
  0xd4   : > { %v436_v59 = vmul.f32 %v1253_v35, %v406_v34  ;;  %v1391_v60 = vpop.permute.xlu0 %401  ;;  %v449_v12 = vadd.f32 %v433_v5, %v352_v19  ;;  %v425_v34 = vmul.f32 %v1253_v35, %v1310_v3 }
  0xd6   : > { %v1393_v62 = vadd.f32 %v436_v59, %v355_v57  ;;  %v522_v59 = vmul.f32 %v1404_v1, %v1377_v52  ;;  %v441_v19 = vadd.f32 %v425_v34, %v344_v10 }
  0xda   : > { %978 = vset.pattern.permute.xlu1 %v1047_v18 }
  0xdb   : > { %583 = vperm.xlu1 %978, %v1161_v8   ;;  %v534_v8 = vmul.f32 %v1404_v1, %v1362_v42 }
  0xdc   : > { %v491_v7 = vpop.permute.xlu1 %490  ;;  %v414_v11 = vpop.permute.xlu0 %413 }
  0xdd   : > { %v530_v13 = vmul.f32 %v1404_v1, %v491_v7  ;;  %v572_v15 = vpop.permute.xlu2 %571  ;;  %v550_v36 = vadd.f32 %v534_v8, %v453_v9  ;;  %v438_v14 = vmul.f32 %v1253_v35, %v414_v11  ;;  %v538_v11 = vadd.f32 %v522_v59, %v441_v19 }
  0xde   : > { %v623_v51 = vmul.f32 %v1398_v63, %v572_v15 }
  0xdf   : > { %v546_v18 = vadd.f32 %v530_v13, %v449_v12  ;;  %v454_v24 = vadd.f32 %v438_v14, %v357_v21  ;;  %v531_v12 = vmul.f32 %v1404_v1, %v495_v61  ;;  %v338_v61 = vmul.f32 %v1237_v30, %v1262_v41 }
  0xe1   : > { %v643_v28 = vadd.f32 %v627_v22, %v546_v18  ;;  %v547_v52 = vadd.f32 %v531_v12, %v1315_v6  ;;  %v435_v6 = vmul.f32 %v1253_v35, %v1391_v60  ;;  %v354_v38 = vadd.f32 %v1247_v32, %v338_v61 }
  0xe2   : > { %v342_v60 = vmul.f32 %v1237_v30, %v1231_v27 }
  0xe3   : > { %v659_v54 = vmax.f32 %v643_v28, 0.0  ;;  %v451_v21 = vadd.f32 %v435_v6, %v354_v38 }
  0xe4   : > { %v1417_v29 = vpop.permute.xlu0 %417 }
  0xe5   : > { %v604_v33 = vpop.permute.xlu1 %603  ;;  %727 = vmatmul.f32.vlgmr.msra.gmra.mxu2 %v659_v54  ;;  %v608_v17 = vpop.permute.xlu2 %607 }
  0xe6   : > { %v631_v37 = vmul.f32 %v1398_v63, %v604_v33  ;;  %v632_v45 = vmul.f32 %v1398_v63, %v608_v17 }
  0xe8   : > { %v647_v2 = vadd.f32 %v631_v37, %v550_v36 }
  0xea   : > { %v663_v40 = vmax.f32 %v647_v2, 0.0 }
  0xec   : > { %739 = vmatmul.f32.vlgmr.msra.gmra.mxu3 %v663_v40 }
  0xed   : > { %v511_v42 = vpop.permute.xlu0 %510  ;;  %v479_v43 = vpop.permute.xlu2 %478 }
  0xee   : > { %v535_v49 = vmul.f32 %v1404_v1, %v511_v42  ;;  %v475_v50 = vpop.permute.xlu1 %474  ;;  %v527_v41 = vmul.f32 %v1404_v1, %v479_v43  ;;  %v439_v43 = vmul.f32 %v1253_v35, %v1417_v29 }
  0xef   : > { %v526_v53 = vmul.f32 %v1404_v1, %v475_v50 }
  0xf0   : > { %v551_v55 = vadd.f32 %v535_v49, %v454_v24 }
  0xf1   : > { %v542_v16 = vadd.f32 %v526_v53, %v1269_v47  ;;  %v543_v53 = vadd.f32 %v527_v41, %v1368_v46 }
  0xf2   : > { %v648_v57 = vadd.f32 %v632_v45, %v551_v55 }
  0xf3   : > { %v639_v25 = vadd.f32 %v623_v51, %v542_v16 }
  0xf4   : > { %v664_v23 = vmax.f32 %v648_v57, 0.0 }
  0xf5   : > { %v655_v5 = vmax.f32 %v639_v25, 0.0  ;;  %v515_v4 = vpop.permute.xlu2 %514  ;;  %v467_v3 = vpop.permute.xlu0 %466  ;;  %v358_v25 = vadd.f32 %v1247_v32, %v342_v60 }
  0xf6   : > { %742 = vmatmul.f32.gmra.mxu3 %v664_v23  ;;  %v536_v27 = vmul.f32 %v1404_v1, %v515_v4  ;;  %v343_v4 = vmul.f32 %v1237_v30, %v1307_v0 }
  0xf7   : > { %715 = vmatmul.f32.vlgmr.msra.gmra.mxu1 %v655_v5  ;;  %v556_v7 = vpop.permute.xlu1 %555  ;;  %v455_v5 = vadd.f32 %v439_v43, %v358_v25 }
  0xf8   : > { %v619_v47 = vmul.f32 %v1398_v63, %v556_v7 }
  0xfa   : > { %v635_v22 = vadd.f32 %v619_v47, %v538_v11 }
  0xfc   : > { %v651_v13 = vmax.f32 %v635_v22, 0.0 }
  0xfe   : > { %703 = vmatmul.f32.vlgmr.msra.gmra.mxu0 %v651_v13  ;;  %v596_v15 = vpop.permute.xlu2 %595  ;;  %v560_v8 = vpop.permute.xlu0 %559 }
  0xff   : > { %v592_v18 = vpop.permute.xlu1 %591  ;;  %v620_v17 = vmul.f32 %v1398_v63, %v560_v8  ;;  %v629_v42 = vmul.f32 %v1398_v63, %v596_v15 }
 0x100   : > { %v628_v20 = vmul.f32 %v1398_v63, %v592_v18  ;;  %v359_v18 = vadd.f32 %v1247_v32, %v343_v4 }
 0x102   : > { %v644_v26 = vadd.f32 %v628_v20, %v547_v52 }
 0x104   : > { %v660_v28 = vmax.f32 %v644_v26, 0.0 }
 0x106   : > { %730 = vmatmul.f32.gmra.mxu2 %v660_v28  ;;  %v580_v47 = vpop.permute.xlu0 %579 }
 0x107   : > { %v422_v54 = vpop.permute.xlu2 %421  ;;  %v625_v12 = vmul.f32 %v1398_v63, %v580_v47 }
 0x108   : > { %v463_v9 = vpop.permute.xlu1 %462 }
 0x109   : > { %v523_v33 = vmul.f32 %v1404_v1, %v463_v9 }
 0x10b   : > { %v539_v36 = vadd.f32 %v523_v33, %v1258_v39  ;;  %v524_v39 = vmul.f32 %v1404_v1, %v467_v3  ;;  %v440_v3 = vmul.f32 %v1253_v35, %v422_v54 }
 0x10d   : > { %v636_v37 = vadd.f32 %v620_v17, %v539_v36  ;;  %v540_v55 = vadd.f32 %v524_v39, %v1370_v48  ;;  %v552_v48 = vadd.f32 %v536_v27, %v455_v5  ;;  %v456_v28 = vadd.f32 %v440_v3, %v359_v18 }
 0x10e   : > { %v568_v36 = vpop.permute.xlu0 %567 }
 0x10f   : > { %v652_v2 = vmax.f32 %v636_v37, 0.0 }
 0x110   : > { %v499_v14 = vpop.permute.xlu1 %498  ;;  %v503_v40 = vpop.permute.xlu2 %502 }
 0x111   : > { %v532_v44 = vmul.f32 %v1404_v1, %v499_v14  ;;  %706 = vmatmul.f32.gmra.mxu0 %v652_v2  ;;  %v533_v30 = vmul.f32 %v1404_v1, %v503_v40  ;;  %v622_v2 = vmul.f32 %v1398_v63, %v568_v36 }
 0x113   : > { %v548_v24 = vadd.f32 %v532_v44, %v451_v21  ;;  %v549_v35 = vadd.f32 %v533_v30, %v1393_v62 }
 0x115   : > { %v645_v45 = vadd.f32 %v629_v42, %v548_v24 }
 0x117   : > { %v661_v49 = vmax.f32 %v645_v45, 0.0 }
 0x119   : > { %v576_v50 = vpop.permute.xlu1 %575  ;;  %733 = vmatmul.f32.gmra.mxu2 %v661_v49  ;;  %v564_v51 = vpop.permute.xlu2 %563 }
 0x11a   : > { %v624_v16 = vmul.f32 %v1398_v63, %v576_v50  ;;  %v621_v10 = vmul.f32 %v1398_v63, %v564_v51 }
 0x11c   : > { %v640_v34 = vadd.f32 %v624_v16, %v543_v53  ;;  %v637_v57 = vadd.f32 %v621_v10, %v540_v55 }
 0x11e   : > { %v656_v59 = vmax.f32 %v640_v34, 0.0  ;;  %v653_v23 = vmax.f32 %v637_v57, 0.0 }
 0x120   : > { %718 = vmatmul.f32.gmra.mxu1 %v656_v59  ;;  %709 = vmatmul.f32.gmra.mxu0 %v653_v23 }
 0x121   : > { %v612_v46 = vpop.permute.xlu1 %611  ;;  %v616_v20 = vpop.permute.xlu2 %615 }
 0x122   : > { %v633_v19 = vmul.f32 %v1398_v63, %v612_v46  ;;  %v634_v8 = vmul.f32 %v1398_v63, %v616_v20 }
 0x124   : > { %v649_v7 = vadd.f32 %v633_v19, %v552_v48 }
 0x126   : > { %v665_v11 = vmax.f32 %v649_v7, 0.0 }
 0x128   : > { %745 = vmatmul.f32.gmra.mxu3 %v665_v11 }
 0x12a   : > { %v483_v29 = vpop.permute.xlu1 %482  ;;  %v487_v38 = vpop.permute.xlu2 %486 }
 0x12b   : > { %v528_v22 = vmul.f32 %v1404_v1, %v483_v29  ;;  %v529_v21 = vmul.f32 %v1404_v1, %v487_v38 }
 0x12d   : > { %v544_v13 = vadd.f32 %v528_v22, %v1293_v58  ;;  %v545_v44 = vadd.f32 %v529_v21, %v1381_v56 }
 0x12f   : > { %v641_v15 = vadd.f32 %v625_v12, %v544_v13 }
 0x131   : > { %v657_v52 = vmax.f32 %v641_v15, 0.0 }
 0x132   : > { %v519_v26 = vpop.permute.xlu1 %518 }
 0x133   : > { %v537_v9 = vmul.f32 %v1404_v1, %v519_v26  ;;  %721 = vmatmul.f32.gmra.mxu1 %v657_v52 }
 0x135   : > { %v553_v33 = vadd.f32 %v537_v9, %v456_v28 }
 0x137   : > { %v650_v17 = vadd.f32 %v634_v8, %v553_v33 }
 0x139   : > { %v666_v0 = vmax.f32 %v650_v17, 0.0 }
 0x13b   : > { %v600_v58 = vpop.permute.xlu1 %599  ;;  %748 = vmatmul.f32.gmra.mxu3 %v666_v0 }
 0x13c   : > { %v630_v32 = vmul.f32 %v1398_v63, %v600_v58 }
 0x13e   : > { %v646_v54 = vadd.f32 %v630_v32, %v549_v35 }
 0x140   : > { %v662_v61 = vmax.f32 %v646_v54, 0.0 }
 0x142   : > { %736 = vmatmul.f32.gmra.mxu2 %v662_v61 }
 0x144   : > { %v471_v6 = vpop.permute.xlu1 %470 }
 0x145   : > { %v525_v37 = vmul.f32 %v1404_v1, %v471_v6 }
 0x147   : > { %v541_v14 = vadd.f32 %v525_v37, %v1344_v31  ;;  %v980_v31 = vld [vmem:[%s1543_s4] ss:$0 sm:$0xff] }
 0x149   : > { %v638_v40 = vadd.f32 %v622_v2, %v541_v14 }
 0x14b   : > { %v654_v62 = vmax.f32 %v638_v40, 0.0 }
 0x14d   : > { %v584_v42 = vpop.permute.xlu1 %583  ;;  %712 = vmatmul.f32.gmra.mxu0 %v654_v62 }
 0x14e   : > { %v626_v24 = vmul.f32 %v1398_v63, %v584_v42 }
 0x150   : > { %v642_v45 = vadd.f32 %v626_v24, %v545_v44 }
 0x152   : > { %v658_v41 = vmax.f32 %v642_v45, 0.0 }
 0x154   : > { %724 = vmatmul.f32.gmra.mxu1 %v658_v41 }
 0x168   : > { %v728_v39 = vpop.f32.mrf.mxu2 }
 0x169   : > { %v729_v49 = vadd.f32 %v980_v31, %v728_v39 }
 0x16b   : > { %760 = vst [vmem:[%s1487_s23 + $0x40] sm:$0xff] %v729_v49 }
 0x16f   : > { %v740_v56 = vpop.f32.mrf.mxu3 }
 0x170   : > { %v741_v63 = vadd.f32 %v980_v31, %v740_v56 }
 0x172   : > { %764 = vst [vmem:[%s1487_s23 + $0x60] sm:$0xff] %v741_v63 }
 0x174   : > { %v716_v1 = vpop.f32.mrf.mxu1 }
 0x175   : > { %v717_v60 = vadd.f32 %v980_v31, %v716_v1 }
 0x177   : > { %756 = vst [vmem:[%s1487_s23 + $0x20] sm:$0xff] %v717_v60 }
 0x179   : > { %v743_v50 = vpop.f32.mrf.mxu3 }
 0x17a   : > { %v744_v51 = vadd.f32 %v980_v31, %v743_v50 }
 0x17b   : > { %v704_v53 = vpop.f32.mrf.mxu0 }
 0x17c   : > { %765 = vst [vmem:[%s1487_s23 + $0x68] sm:$0xff] %v744_v51  ;;  %v705_v55 = vadd.f32 %v980_v31, %v704_v53 }
 0x17e   : > { %752 = vst [vmem:[%s1487_s23] sm:$0xff] %v705_v55 }
 0x189   : > { %v731_v16 = vpop.f32.mrf.mxu2 }
 0x18a   : > { %v732_v10 = vadd.f32 %v980_v31, %v731_v16 }
 0x18c   : > { %761 = vst [vmem:[%s1487_s23 + $0x48] sm:$0xff] %v732_v10 }
 0x18e   : > { %v707_v43 = vpop.f32.mrf.mxu0 }
 0x18f   : > { %v708_v34 = vadd.f32 %v980_v31, %v707_v43 }
 0x191   : > { %753 = vst [vmem:[%s1487_s23 + $0x8] sm:$0xff] %v708_v34 }
 0x19c   : > { %v734_v57 = vpop.f32.mrf.mxu2 }
 0x19d   : > { %v735_v25 = vadd.f32 %v980_v31, %v734_v57  ;;  %v719_v27 = vpop.f32.mrf.mxu1  ;;  %v710_v59 = vpop.f32.mrf.mxu0 }
 0x19e   : > { %v720_v23 = vadd.f32 %v980_v31, %v719_v27  ;;  %v711_v5 = vadd.f32 %v980_v31, %v710_v59 }
 0x19f   : > { %762 = vst [vmem:[%s1487_s23 + $0x50] sm:$0xff] %v735_v25 }
 0x1a0   : > { %757 = vst [vmem:[%s1487_s23 + $0x28] sm:$0xff] %v720_v23 }
 0x1a1   : > { %754 = vst [vmem:[%s1487_s23 + $0x10] sm:$0xff] %v711_v5 }
 0x1ab   : > { %v746_v46 = vpop.f32.mrf.mxu3 }
 0x1ac   : > { %v747_v48 = vadd.f32 %v980_v31, %v746_v46 }
 0x1ae   : > { %766 = vst [vmem:[%s1487_s23 + $0x70] sm:$0xff] %v747_v48 }
 0x1b0   : > { %v722_v19 = vpop.f32.mrf.mxu1 }
 0x1b1   : > { %v723_v7 = vadd.f32 %v980_v31, %v722_v19 }
 0x1b3   : > { %758 = vst [vmem:[%s1487_s23 + $0x30] sm:$0xff] %v723_v7 }
 0x1be   : > { %v749_v11 = vpop.f32.mrf.mxu3 }
 0x1bf   : > { %v750_v47 = vadd.f32 %v980_v31, %v749_v11 }
 0x1c1   : > { %767 = vst [vmem:[%s1487_s23 + $0x78] sm:$0xff] %v750_v47 }
 0x1c5   : > { %v737_v29 = vpop.f32.mrf.mxu2 }
 0x1c6   : > { %v738_v22 = vadd.f32 %v980_v31, %v737_v29 }
 0x1c8   : > { %763 = vst [vmem:[%s1487_s23 + $0x58] sm:$0xff] %v738_v22 }
 0x1ca   : > { %v713_v12 = vpop.f32.mrf.mxu0 }
 0x1cb   : > { %v714_v4 = vadd.f32 %v980_v31, %v713_v12 }
 0x1cd   : > { %755 = vst [vmem:[%s1487_s23 + $0x18] sm:$0xff] %v714_v4 }
 0x1d1   : > { %v725_v13 = vpop.f32.mrf.mxu1 }
 0x1d2   : > { %v726_v3 = vadd.f32 %v980_v31, %v725_v13 }
 0x1d4   : > { %759 = vst [vmem:[%s1487_s23 + $0x38] sm:$0xff] %v726_v3 }
 0x1d5   : > { %1008 = shalt.err (!%p1005_p3)
}
 0x1d6   : > { %s1049_s14 = smov 128   ;;  %s1050_s17 = smov 8  }
 0x1d7   : > { %907 = dma.vmem_to_hbm [thread:$0]  (%p1119_p5), %s782_s7, 2048, %s784_s8, %s769_s9, %s1049_s14, %s1049_s14, %s1050_s17  }
 0x1d8 PF: > { %p913_p4 = scmp.ge.s32.totalorder %s1043_s21, 2  ;;  %s798_s23 = sand.u32 1, %s1031_s18  }
 0x1d9   : > { %s799_s25 = scalar_lea.sflag [#allocation3], %s798_s23 }
 0x1da   : > { %p910_p7 = pnand %p913_p4, %p1123_p6 }
 0x1dc   : > { %p911_p8 = pneg %p910_p7 }
 0x1de   : > { %1026 = dma.done.wait (%p911_p8), %s799_s25, 2048  }
 0x1df   : > { %1028 = vsyncadd (%p911_p8), %s799_s25, 4294965248  ;;  %p15_p9 = scmp.ge.s32.totalorder %s1106_s24, 4   ;;  %s1547_s18 = smov %s1035_s19 }
 0x1e0   : > { %s1548_s19 = smov %s1039_s20  ;;  %s1549_s20 = smov %s1117_s27 }
 0x1e1   : > { %s1550_s21 = smov %s1106_s24  ;;  %17 = sbr.rel (!%p15_p9) target bundleno = 3 (0x3), region = 75 }
 0x1e6   :  { %805 = vsyncpa [#allocation3], 1 }
 0x1e7   :  { %807 = vsyncpa [#allocation3 + $0x1], 1 }

</bundles_post_ra>
